<compile_context>
chip_gen: v7x
topology: tpu7x:2x2x1
jax: 0.10.0
libtpu: 0.0.40
codegen_flags: <defaults>
</compile_context>

<pallas_src>
import functools

import jax
import jax.numpy as jnp
from jax.experimental import pallas as pl
from jax.experimental.pallas import tpu as pltpu


def _round_up(x, m):
    return ((x + m - 1) // m) * m


def _fused_mlp_kernel(*refs, n_layers, compute_dtype):
    """refs = (x_ref, w_0, b_0, w_1, b_1, ..., w_{L-1}, b_{L-1}, o_ref).

    Layout: activations (F, TILE_N)  -- batch on lanes, features on sublanes.
            weights     (f_out, f_in) -- PyTorch nn.Linear convention.
            biases      (f_out, 1)    -- broadcast over the lane (batch) axis.
    Computes h <- tanh(W @ h + b) for all but the last layer, then W @ h + b.
    """
    x_ref = refs[0]
    o_ref = refs[-1]
    param_refs = refs[1:-1]

    h = x_ref[...].astype(compute_dtype)
    for li in range(n_layers):  # unrolled at trace time (handful of layers)
        w = param_refs[2 * li][...].astype(compute_dtype)
        b = param_refs[2 * li + 1][...]  # (f_out, 1) float32
        y = jnp.dot(w, h, preferred_element_type=jnp.float32) + b
        h = jnp.tanh(y.astype(compute_dtype)) if li < n_layers - 1 else y
    o_ref[...] = h.astype(o_ref.dtype)


def prepare_collocation(y_t, *, lane_align=128):
    """ONE-TIME layout hoist: (N, f_in) -> zero-padded lane-major (f_in, n_pad).

    Collocation points are reused every training step, so do this once and keep
    the lane-major slab around instead of transposing/padding per call.
    """
    n, f_in = y_t.shape
    n_pad = _round_up(max(n, 1), lane_align)
    return jnp.zeros((f_in, n_pad), y_t.dtype).at[:, :n].set(y_t.T)


def pinn_forward_lane_major(params, x_lm, *, tile_n_max=4096,
                            compute_dtype=jnp.float32):
    """Fused MLP on a lane-major input slab.

    params : list of (w, b); w is (f_out, f_in) (PyTorch layout), b is (f_out,).
    x_lm   : (f_in0, n_pad) lane-major collocation points, n_pad % 128 == 0.
    returns: (f_out_last, n_pad) lane-major output.
    """
    f_in0, n_pad = x_lm.shape
    assert n_pad % 128 == 0, "lane-major batch axis must be 128-aligned"
    f_out_last = params[-1][0].shape[0]
    dtype = x_lm.dtype

    # Tile sizing: big tiles to amortize grid-step overhead, but always >= 2
    # grid steps when the batch allows it so v7x's two TensorCores both work.
    tile_n = min(tile_n_max, n_pad)
    if n_pad >= 256:
        tile_n = min(tile_n, _round_up(n_pad // 2, 128))
    num_tiles = pl.cdiv(n_pad, tile_n)  # edge blocks are clamped by Pallas

    inputs = [x_lm]
    in_specs = [pl.BlockSpec((f_in0, tile_n), lambda i: (0, i))]
    for (w, b) in params:
        f_out, f_in = w.shape
        inputs.append(w)
        in_specs.append(pl.BlockSpec((f_out, f_in), lambda i: (0, 0)))
        inputs.append(b.reshape(f_out, 1))
        in_specs.append(pl.BlockSpec((f_out, 1), lambda i: (0, 0)))

    out_specs = pl.BlockSpec((f_out_last, tile_n), lambda i: (0, i))
    out_shape = jax.ShapeDtypeStruct((f_out_last, n_pad), dtype)

    # Advisory cost estimate for XLA's scheduler.
    flops = 2 * n_pad * sum(int(w.shape[0]) * int(w.shape[1]) for (w, _) in params)
    transcendentals = n_pad * sum(int(w.shape[0]) for (w, _) in params[:-1])
    bytes_accessed = (
        sum(int(a.size) * int(jnp.dtype(a.dtype).itemsize) for a in inputs)
        + n_pad * f_out_last * int(jnp.dtype(dtype).itemsize))

    kernel = functools.partial(_fused_mlp_kernel, n_layers=len(params),
                               compute_dtype=compute_dtype)

    return pl.pallas_call(
        kernel,
        out_shape=out_shape,
        grid=(num_tiles,),
        in_specs=in_specs,
        out_specs=out_specs,
        compiler_params=pltpu.CompilerParams(
            dimension_semantics=("parallel",)),
        cost_estimate=pl.CostEstimate(
            flops=flops,
            transcendentals=transcendentals,
            bytes_accessed=bytes_accessed),
    )(*inputs)


def pinn_forward(params, y_t, *, tile_n_max=4096, compute_dtype=jnp.float32):
    """Convenience wrapper keeping the original (N, f_in) -> (N, f_out) API.

    In a training loop, call prepare_collocation() once and use
    pinn_forward_lane_major() directly to avoid the per-call layout change.
    """
    n = y_t.shape[0]
    x_lm = prepare_collocation(y_t)
    out_lm = pinn_forward_lane_major(params, x_lm, tile_n_max=tile_n_max,
                                     compute_dtype=compute_dtype)
    return out_lm[:, :n].T


def init_pinn_params(layers, key):
    """Xavier-normal weights ((f_out, f_in) PyTorch layout), zero biases."""
    params = []
    for i in range(len(layers) - 1):
        key, sub = jax.random.split(key)
        fan_in, fan_out = layers[i], layers[i + 1]
        std = (2.0 / (fan_in + fan_out)) ** 0.5
        w = std * jax.random.normal(sub, (fan_out, fan_in), dtype=jnp.float32)
        b = jnp.zeros((fan_out,), dtype=jnp.float32)
        params.append((w, b))
    return params


if __name__ == "__main__":
    # 2D DAE PINN: input (x, y) coordinates -> hidden tanh layers -> 1 output.
    layers = [2, 32, 32, 1]

    key = jax.random.PRNGKey(0)
    key, pkey = jax.random.split(key)
    params = init_pinn_params(layers, pkey)

    def ref_forward(y):  # PyTorch Linear: y = x @ W.T + b
        h = y
        for (w, b) in params[:-1]:
            h = jnp.tanh(h @ w.T + b)
        return h @ params[-1][0].T + params[-1][1]

    # --- small demo batch: lane-major hot path (layout hoisted once) -------
    batch = 64
    key, xkey = jax.random.split(key)
    y_t = jax.random.normal(xkey, (batch, layers[0]), dtype=jnp.float32)

    x_lm = prepare_collocation(y_t)              # one-time layout conversion
    out_lm = pinn_forward_lane_major(params, x_lm)
    jax.block_until_ready(out_lm)
    h0 = out_lm[:, :batch].T

    assert h0.shape == (batch, layers[-1])
    assert jnp.allclose(h0, ref_forward(y_t), atol=1e-5, rtol=1e-5)

    # --- multi-tile + edge-block path (exercises v7x >=2-tile split) -------
    key, xkey2 = jax.random.split(key)
    y_t2 = jax.random.normal(xkey2, (300, layers[0]), dtype=jnp.float32)
    h1 = pinn_forward(params, y_t2)              # compat wrapper
    jax.block_until_ready(h1)
    assert h1.shape == (300, layers[-1])
    assert jnp.allclose(h1, ref_forward(y_t2), atol=1e-5, rtol=1e-5)

    print("KERNEL_OK")
</pallas_src>

<mosaic_0001>
module attributes {stable_mosaic.version = 11 : i64} {
  func.func @_fused_mlp_kernel(%arg0: i32, %arg1: memref<2x128xf32, #tpu.memory_space<vmem>>, %arg2: memref<32x2xf32, #tpu.memory_space<vmem>>, %arg3: memref<32x1xf32, #tpu.memory_space<vmem>>, %arg4: memref<32x32xf32, #tpu.memory_space<vmem>>, %arg5: memref<32x1xf32, #tpu.memory_space<vmem>>, %arg6: memref<1x32xf32, #tpu.memory_space<vmem>>, %arg7: memref<1x1xf32, #tpu.memory_space<vmem>>, %arg8: memref<1x128xf32, #tpu.memory_space<vmem>>) attributes {dimension_semantics = [#tpu.dimension_semantics<parallel>], iteration_bounds = array<i64: 1>, scalar_prefetch = 0 : i64, scratch_operands = 0 : i64, tpu.core_type = #tpu.core_type<tc>, window_params = [{transform_indices = @transform_0, window_bounds = array<i64: 2, 128>}, {pipeline_mode = #tpu.pipeline_mode<synchronous>, transform_indices = @transform_1, window_bounds = array<i64: 32, 2>}, {pipeline_mode = #tpu.pipeline_mode<synchronous>, transform_indices = @transform_2, window_bounds = array<i64: 32, 1>}, {pipeline_mode = #tpu.pipeline_mode<synchronous>, transform_indices = @transform_3, window_bounds = array<i64: 32, 32>}, {pipeline_mode = #tpu.pipeline_mode<synchronous>, transform_indices = @transform_4, window_bounds = array<i64: 32, 1>}, {pipeline_mode = #tpu.pipeline_mode<synchronous>, transform_indices = @transform_5, window_bounds = array<i64: 1, 32>}, {pipeline_mode = #tpu.pipeline_mode<synchronous>, transform_indices = @transform_6, window_bounds = array<i64: 1, 1>}, {transform_indices = @transform_7, window_bounds = array<i64: 1, 128>}]} {
    %c0 = arith.constant 0 : index
    %c0_0 = arith.constant 0 : index
    %0 = vector.load %arg1[%c0, %c0_0] : memref<2x128xf32, #tpu.memory_space<vmem>>, vector<2x128xf32>
    %c0_1 = arith.constant 0 : index
    %c0_2 = arith.constant 0 : index
    %1 = vector.load %arg2[%c0_1, %c0_2] : memref<32x2xf32, #tpu.memory_space<vmem>>, vector<32x2xf32>
    %c0_3 = arith.constant 0 : index
    %c0_4 = arith.constant 0 : index
    %2 = vector.load %arg3[%c0_3, %c0_4] : memref<32x1xf32, #tpu.memory_space<vmem>>, vector<32x1xf32>
    %cst = arith.constant dense<0.000000e+00> : vector<32x128xf32>
    %3 = tpu.matmul %1, %0, %cst {dimension_numbers = #tpu.dot_dimension_numbers<[1], [0], [0], [1], [0, 0, 1, 1], [], []>} : vector<32x2xf32>, vector<2x128xf32>, vector<32x128xf32> -> vector<32x128xf32>
    %4 = vector.broadcast %2 : vector<32x1xf32> to vector<32x128xf32>
    %5 = arith.addf %3, %4 : vector<32x128xf32>
    %6 = math.tanh %5 : vector<32x128xf32>
    %c0_5 = arith.constant 0 : index
    %c0_6 = arith.constant 0 : index
    %7 = vector.load %arg4[%c0_5, %c0_6] : memref<32x32xf32, #tpu.memory_space<vmem>>, vector<32x32xf32>
    %c0_7 = arith.constant 0 : index
    %c0_8 = arith.constant 0 : index
    %8 = vector.load %arg5[%c0_7, %c0_8] : memref<32x1xf32, #tpu.memory_space<vmem>>, vector<32x1xf32>
    %cst_9 = arith.constant dense<0.000000e+00> : vector<32x128xf32>
    %9 = tpu.matmul %7, %6, %cst_9 {dimension_numbers = #tpu.dot_dimension_numbers<[1], [0], [0], [1], [0, 0, 1, 1], [], []>} : vector<32x32xf32>, vector<32x128xf32>, vector<32x128xf32> -> vector<32x128xf32>
    %10 = vector.broadcast %8 : vector<32x1xf32> to vector<32x128xf32>
    %11 = arith.addf %9, %10 : vector<32x128xf32>
    %12 = math.tanh %11 : vector<32x128xf32>
    %c0_10 = arith.constant 0 : index
    %c0_11 = arith.constant 0 : index
    %13 = vector.load %arg6[%c0_10, %c0_11] : memref<1x32xf32, #tpu.memory_space<vmem>>, vector<1x32xf32>
    %c0_12 = arith.constant 0 : index
    %c0_13 = arith.constant 0 : index
    %14 = vector.load %arg7[%c0_12, %c0_13] : memref<1x1xf32, #tpu.memory_space<vmem>>, vector<1x1xf32>
    %cst_14 = arith.constant dense<0.000000e+00> : vector<1x128xf32>
    %15 = tpu.matmul %13, %12, %cst_14 {dimension_numbers = #tpu.dot_dimension_numbers<[1], [0], [0], [1], [0, 0, 1, 1], [], []>} : vector<1x32xf32>, vector<32x128xf32>, vector<1x128xf32> -> vector<1x128xf32>
    %16 = vector.broadcast %14 : vector<1x1xf32> to vector<1x128xf32>
    %17 = arith.addf %15, %16 : vector<1x128xf32>
    %c0_15 = arith.constant 0 : index
    %c0_16 = arith.constant 0 : index
    %18 = vector.load %arg8[%c0_15, %c0_16] : memref<1x128xf32, #tpu.memory_space<vmem>>, vector<1x128xf32>
    tpu.vector_store %arg8[%c0_15, %c0_16], %17 {strides = array<i32>} : memref<1x128xf32, #tpu.memory_space<vmem>>, vector<1x128xf32>,
    return
  }
  func.func @transform_0(%arg0: i32) -> (i32, i32) {
    %c0_i32 = arith.constant 0 : i32
    %c0_i32_0 = arith.constant 0 : i32
    return %c0_i32, %arg0 : i32, i32
  }
  func.func @transform_1(%arg0: i32) -> (i32, i32) {
    %c0_i32 = arith.constant 0 : i32
    %c0_i32_0 = arith.constant 0 : i32
    %c0_i32_1 = arith.constant 0 : i32
    return %c0_i32, %c0_i32_0 : i32, i32
  }
  func.func @transform_2(%arg0: i32) -> (i32, i32) {
    %c0_i32 = arith.constant 0 : i32
    %c0_i32_0 = arith.constant 0 : i32
    %c0_i32_1 = arith.constant 0 : i32
    return %c0_i32, %c0_i32_0 : i32, i32
  }
  func.func @transform_3(%arg0: i32) -> (i32, i32) {
    %c0_i32 = arith.constant 0 : i32
    %c0_i32_0 = arith.constant 0 : i32
    %c0_i32_1 = arith.constant 0 : i32
    return %c0_i32, %c0_i32_0 : i32, i32
  }
  func.func @transform_4(%arg0: i32) -> (i32, i32) {
    %c0_i32 = arith.constant 0 : i32
    %c0_i32_0 = arith.constant 0 : i32
    %c0_i32_1 = arith.constant 0 : i32
    return %c0_i32, %c0_i32_0 : i32, i32
  }
  func.func @transform_5(%arg0: i32) -> (i32, i32) {
    %c0_i32 = arith.constant 0 : i32
    %c0_i32_0 = arith.constant 0 : i32
    %c0_i32_1 = arith.constant 0 : i32
    return %c0_i32, %c0_i32_0 : i32, i32
  }
  func.func @transform_6(%arg0: i32) -> (i32, i32) {
    %c0_i32 = arith.constant 0 : i32
    %c0_i32_0 = arith.constant 0 : i32
    %c0_i32_1 = arith.constant 0 : i32
    return %c0_i32, %c0_i32_0 : i32, i32
  }
  func.func @transform_7(%arg0: i32) -> (i32, i32) {
    %c0_i32 = arith.constant 0 : i32
    %c0_i32_0 = arith.constant 0 : i32
    return %c0_i32, %arg0 : i32, i32
  }
}

</mosaic_0001>

<bundles_post_ra>
// kernel: tpu_custom_call.1
= control target key start
LH: loop header
LB: loop body
LE: loop exit
PB: predicated region body
PF: predicated region fallthrough
CT: control target
= control target key end

     0   :  { %s638_s0 = inlined_call_operand.vmem [shape: f32[2,128], index: 0, kind: input, shape index: {}]   ;;  %s639_s1 = inlined_call_operand.vmem [shape: f32[32,2], index: 1, kind: input, shape index: {}]   ;;  %s640_s2 = inlined_call_operand.vmem [shape: f32[32,1], index: 2, kind: input, shape index: {}]   ;;  %s641_s3 = inlined_call_operand.vmem [shape: f32[32,32], index: 3, kind: input, shape index: {}]   ;;  %s642_s4 = inlined_call_operand.vmem [shape: f32[32,1], index: 4, kind: input, shape index: {}]   ;;  %s643_s5 = inlined_call_operand.vmem [shape: f32[1,32], index: 5, kind: input, shape index: {}]   ;;  %s644_s6 = inlined_call_operand.<no memory space> [shape: f32[1,1], index: 6, kind: input, shape index: {}]   ;;  %s645_s7 = inlined_call_operand.hbm [shape: f32[1,128], index: 7, kind: output, shape index: {}]  }
   0x1   :  { %v12_v0 = vstv %s644_s6 }
   0x2   :  { %13 = vst [vmem:[#allocation2] sm:$0x1] %v12_v0 }
   0x3   :  { %v29_v1 = vld [vmem:[%s638_s0] sm:$0x3]  ;;  %vm71_vm0 = vcmask 1041408   ;;  %vm58_vm1 = vcmask 15360   ;;  %v31_v3 = vld [vmem:[%s639_s1 + $0x8] sm:$0xff]  ;;  %v32_v4 = vld [vmem:[%s639_s1 + $0x10] sm:$0xff] }
   0x4   :  { %v30_v2 = vld [vmem:[%s639_s1] sm:$0xff]  ;;  %421 = vmatprep.subr.msk.mxu0 %vm71_vm0, %v29_v1  ;;  %v515_v6 = vmov 0   ;;  %v36_v7 = vld [vmem:[%s640_s2 + $0x10] sm:$0xff]  ;;  %v33_v8 = vld [vmem:[%s639_s1 + $0x18] sm:$0xff] }
   0x5   :  { %423 = vmatprep.mubr.msk.f32.mxu0 %vm58_vm1, %v30_v2  ;;  %v34_v5 = vld [vmem:[%s640_s2] sm:$0xff]  ;;  %422 = vmatpush3.msk.msra.mxu0 %vm71_vm0, %v29_v1  ;;  %v35_v9 = vld [vmem:[%s640_s2 + $0x8] sm:$0xff] }
   0x6   :  { %473 = vset.pattern.permute.xlu0 %v515_v6  ;;  %424 = vmatmul.mubr.msk.f32.vlgmr.msra.gmra.mrb[0].mxu0 %vm58_vm1, %v31_v3 }
   0x7   :  { %40 = vperm.xlu0 %473, %v34_v5   ;;  %426 = vmatprep.mubr.msk.f32.mxu0 %vm58_vm1, %v32_v4 }
   0x8   :  { %474 = vset.pattern.permute.xlu1 %v515_v6 }
   0x9   :  { %14 = vsyncpa [#allocation4], 0  ;;  %50 = vperm.xlu1 %474, %v36_v7   ;;  %v37_v10 = vld [vmem:[%s640_s2 + $0x18] sm:$0xff]  ;;  %v168_v11 = vld [vmem:[%s642_s4] sm:$0xff]  ;;  %vm192_vm2 = vcmask 261120   ;;  %v516_v38 = vmov 0.0|0.0   ;;  %v301_v59 = vlaneseq }
   0xa   :  { %427 = vmatmul.mubr.msk.f32.gmra.mrb[2].mxu0 %vm58_vm1, %v33_v8  ;;  %v169_v12 = vld [vmem:[%s642_s4 + $0x8] sm:$0xff]  ;;  %v170_v13 = vld [vmem:[%s642_s4 + $0x10] sm:$0xff]  ;;  %v171_v14 = vld [vmem:[%s642_s4 + $0x18] sm:$0xff]  ;;  %462 = vmatprep.subr.bf16.mxu0 %v516_v38  ;;  %vm517_vm3 = vmmov 0   ;;  %v518_v39 = vmov 0.0   ;;  %s519_s6 = smov [#allocation3]  }
   0xb   :  { %45 = vperm.xlu0 %473, %v35_v9   ;;  %v295_v15 = vld [vmem:[#allocation2] sm:$0x1]  ;;  %v165_v35 = vld [vmem:[%s641_s3 + $0x8] sm:$0xff]  ;;  %v166_v36 = vld [vmem:[%s641_s3 + $0x10] sm:$0xff]  ;;  %451 = vmatprep.mubr.msk.f32.mxu0 %vm517_vm3, %v518_v39  ;;  %v302_v60 = vshrl.u32 %v301_v59, 7  ;;  %s385_s10 = sshll.u32 %s519_s6, 4  ;;  %s386_s10 = int_to_ptr.vmem [resolvable:$true] %s385_s10 }
   0xc   :  { %v164_v16 = vld [vmem:[%s641_s3] sm:$0xff]  ;;  %v167_v37 = vld [vmem:[%s641_s3 + $0x18] sm:$0xff]  ;;  %s491_s11 = scalar_lea.vmem %s386_s10, 16  ;;  %s495_s0 = scalar_lea.vmem %s386_s10, 32 }
   0xd   :  { %55 = vperm.xlu1 %474, %v37_v10   ;;  %437 = vmatprep.mubr.msk.f32.mxu1 %vm192_vm2, %v164_v16  ;;  %v294_v58 = vld [vmem:[%s643_s5] sm:$0x1]  ;;  %v303_v61 = vsub.s32 0, %v302_v60  ;;  %p492_p0 = scmp.ne.s32.totalorder %s386_s10, %s491_s11  ;;  %p496_p1 = scmp.lt.s32.totalorder %s386_s10, %s386_s10 }
   0xe   :  { %p497_p2 = scmp.lt.s32.totalorder %s495_s0, %s491_s11 }
   0xf   :  { %174 = vperm.xlu0 %473, %v168_v11  }
  0x10   :  { %p498_p3 = por %p497_p2, %p496_p1 }
  0x11   :  { %179 = vperm.xlu1 %474, %v169_v12  }
  0x12   :  { %p499_p4 = pnand %p498_p3, %p492_p0 }
  0x13   :  { %184 = vperm.xlu0 %473, %v170_v13  }
  0x15   :  { %189 = vperm.xlu1 %474, %v171_v14  }
  0x17   :  { %298 = vperm.xlu0 %473, %v295_v15  }
  0x86   :  { %v41_v17 = vpop.permute.xlu0 %40 }
  0x88   :  { %v51_v18 = vpop.permute.xlu1 %50 }
  0x8a   :  { %v46_v19 = vpop.permute.xlu0 %45 }
  0x8c   :  { %v56_v24 = vpop.permute.xlu1 %55 }
  0x8e   :  { %v175_v41 = vpop.permute.xlu0 %174 }
  0x90   :  { %v180_v40 = vpop.permute.xlu1 %179 }
  0x92   :  { %v185_v48 = vpop.permute.xlu0 %184 }
  0x94   :  { %v190_v46 = vpop.permute.xlu1 %189 }
  0x96   :  { %v299_v62 = vpop.permute.xlu0 %298 }
  0x97   :  { %v304_v63 = vrot.slane %v299_v62, %v303_v61 }
  0xd9   :  { %v425_v20 = vpop.f32.mrb[0].mxu0 }
  0xda   :  { %v147_v21 = vadd.f32 %v425_v20, %v46_v19  ;;  %v141_v22 = vpop.f32.mrb[1].mxu0 }
  0xdb   :  { %v142_v23 = vadd.f32 %v141_v22, %v41_v17 }
  0xdc   :  { %475 = vtanh.f32 %v147_v21 }
  0xdd   :  { %477 = vtanh.f32 %v142_v23  ;;  %v428_v25 = vpop.f32.mrb[2].mxu0 }
  0xde   :  { %v157_v26 = vadd.f32 %v428_v25, %v56_v24  ;;  %v151_v27 = vpop.f32.mrb[3].mxu0 }
  0xdf   :  { %v152_v28 = vadd.f32 %v151_v27, %v51_v18 }
  0xe0   :  { %479 = vtanh.f32 %v157_v26 }
  0xe1   :  { %481 = vtanh.f32 %v152_v28 }
  0xe6   :  { %v476_v29 = vpop.eup %475 }
  0xe7   :  { %v478_v30 = vpop.eup %477 }
  0xe8   :  { %v454_v31 = vpack.c.bf16 %v476_v29, %v478_v30 }
  0xea   :  { %v480_v32 = vpop.eup %479  ;;  %455 = vmatprep.subr.bf16.mxu1 %v454_v31 }
  0xeb   :  { %v482_v33 = vpop.eup %481  ;;  %457 = vmatpush3.bf16.msra.mxu1 %v454_v31 }
  0xec   :  { %v458_v34 = vpack.c.bf16 %v480_v32, %v482_v33 }
  0xee   :  { %459 = vmatprep.subr.bf16.mxu1 %v458_v34 }
  0xef   :  { %461 = vmatpush3.bf16.msra.mxu1 %v458_v34 }
  0xf2   :  { %438 = vmatmul.mubr.msk.f32.vlgmr.msra.gmra.mrb[0].mxu1 %vm192_vm2, %v165_v35 }
  0xf3   :  { %440 = vmatprep.mubr.msk.f32.mxu1 %vm192_vm2, %v166_v36 }
  0xf6   :  { %441 = vmatmul.mubr.msk.f32.gmra.mrb[2].mxu1 %vm192_vm2, %v167_v37 }
 0x1c5   :  { %v439_v42 = vpop.f32.mrb[0].mxu1 }
 0x1c6   :  { %v277_v43 = vadd.f32 %v439_v42, %v180_v40  ;;  %v271_v44 = vpop.f32.mrb[1].mxu1 }
 0x1c7   :  { %v272_v45 = vadd.f32 %v271_v44, %v175_v41 }
 0x1c8   :  { %483 = vtanh.f32 %v277_v43 }
 0x1c9   :  { %485 = vtanh.f32 %v272_v45  ;;  %v442_v47 = vpop.f32.mrb[2].mxu1 }
 0x1ca   :  { %v287_v49 = vadd.f32 %v442_v47, %v190_v46  ;;  %v281_v50 = vpop.f32.mrb[3].mxu1 }
 0x1cb   :  { %v282_v51 = vadd.f32 %v281_v50, %v185_v48 }
 0x1cc   :  { %487 = vtanh.f32 %v287_v49 }
 0x1cd   :  { %489 = vtanh.f32 %v282_v51 }
 0x1d2   :  { %v484_v52 = vpop.eup %483 }
 0x1d3   :  { %v486_v53 = vpop.eup %485 }
 0x1d4   :  { %v463_v54 = vpack.c.bf16 %v484_v52, %v486_v53 }
 0x1d6   :  { %v488_v55 = vpop.eup %487  ;;  %464 = vmatpush3.bf16.msra.mxu0 %v463_v54 }
 0x1d7   :  { %v490_v56 = vpop.eup %489  ;;  %465 = vmatprep.subr.bf16.mxu0 %v516_v38 }
 0x1d8   :  { %v466_v57 = vpack.c.bf16 %v488_v55, %v490_v56 }
 0x1da   :  { %467 = vmatpush3.bf16.msra.mxu0 %v466_v57 }
 0x1dd   :  { %452 = vmatmul.mubr.msk.f32.vlgmr.msra.gmra.mrb[4].mxu0 %vm192_vm2, %v294_v58 }
 0x2b0   :  { %v374_v0 = vpop.f32.mrb[4].mxu0 }
 0x2b1   :  { %v375_v1 = vadd.f32 %v374_v0, %v304_v63  ;;  %v453_v2 = vpop.f32.mrb[5].mxu0 }
 0x2b3   :  { %378 = vst [vmem:[#allocation3] sm:$0x1] %v375_v1 }
 0x2b4   :  { %502 = shalt.err (!%p499_p4)
}
 0x2b5   :  { %s503_s13 = scalar_lea.hbm %s645_s7, 16 }
 0x2b6   :  { %p504_p5 = scmp.ne.s32.totalorder %s645_s7, %s503_s13  ;;  %p507_p6 = scmp.lt.u32.totalorder %s503_s13, %s645_s7 }
 0x2b8   :  { %p509_p7 = pnand %p507_p6, %p504_p5 }
 0x2ba   :  { %512 = shalt.err (!%p509_p7)
}
 0x2bb   :  { %388 = dma.vmem_to_hbm [thread:$0]  %s386_s10, 16, %s645_s7, [#allocation4]  }
 0x2bc   :  { %513 = dma.done.wait [#allocation4], 16  }
 0x2bd   :  { %514 = vsyncadd [#allocation4], 4294967280 }
 0x2be   :  { %392 = vsyncpa [#allocation4], 1 }

</bundles_post_ra>
